<compile_context>
chip_gen: v6e
topology: v6e:2x2x1
jax: 0.10.0
libtpu: 0.0.40
codegen_flags: <defaults>
</compile_context>

<pallas_src>
import functools

import jax
import jax.numpy as jnp
from jax.experimental import pallas as pl
from jax.experimental.pallas import tpu as pltpu


# ----------------------------------------------------------------------------
# tiling helpers
# ----------------------------------------------------------------------------
def _pick_tile(dim, cap):
    """Largest tile that exactly divides `dim`: the full dim if it fits under
    `cap`, otherwise the largest multiple of 128 dividing it (fallback: full)."""
    if dim <= cap:
        return dim
    best = 0
    for d in range(128, cap + 1, 128):
        if dim % d == 0:
            best = d
    return best if best > 0 else dim


def _pick_spatial_tile(hw, cap=512):
    """Largest multiple-of-8 divisor of hw that is <= cap (full hw if small)."""
    if hw <= cap:
        return hw
    best = 0
    for d in range(8, cap + 1, 8):
        if hw % d == 0:
            best = d
    return best if best > 0 else hw


# Per-batch GroupNorm slab (hw * c f32 elements) below which we run the fully
# fused single-pass GroupNorm kernel.  1M elems = 4 MiB per slab.
_GN_FUSE_MAX_ELEMS = 1024 * 1024


# ----------------------------------------------------------------------------
# Pallas kernels
# ----------------------------------------------------------------------------
def ws_kernel(w_ref, o_ref):
    # Weight standardization: per output-channel (row) mean/var over (cin*kh*kw).
    w = w_ref[...]
    m = jnp.mean(w, axis=1, keepdims=True)
    v = jnp.maximum(jnp.mean(w * w, axis=1, keepdims=True) - m * m, 0.0)
    o_ref[...] = (w - m) / jnp.sqrt(v + 1e-5)


def matmul_kernel(a_ref, b_ref, o_ref, acc_ref):
    # 3-D tiled matmul: grid = (M tiles, N tiles, K tiles); K is the reduction
    # axis (last, "arbitrary"); acc_ref is an f32 VMEM scratch accumulator.
    @pl.when(pl.program_id(2) == 0)
    def _():
        acc_ref[...] = jnp.zeros_like(acc_ref)

    acc_ref[...] += jnp.dot(a_ref[...], b_ref[...],
                            preferred_element_type=jnp.float32)

    @pl.when(pl.program_id(2) == pl.num_programs(2) - 1)
    def _():
        o_ref[...] = acc_ref[...]


def _gn_normalize(x, gamma, beta, cg, eps):
    """x: (hw, c) f32; gamma/beta: (1, c). Returns normalized (hw, c)."""
    hw, c = x.shape
    csum = jnp.sum(x, axis=0, keepdims=True)             # (1, c)
    csq = jnp.sum(x * x, axis=0, keepdims=True)          # (1, c)
    if cg == 1:
        gsum, gsq = csum, csq
    else:
        # Per-channel -> per-group sums (broadcast back to channels) via a tiny
        # block-diagonal (c, c) matmul.  Keeps the reduction lane-resident.
        gi = jax.lax.broadcasted_iota(jnp.int32, (c, c), 0) // cg
        gj = jax.lax.broadcasted_iota(jnp.int32, (c, c), 1) // cg
        sel = (gi == gj).astype(jnp.float32)
        zeros = jnp.zeros((6, c), jnp.float32)           # pad LHS to 8 sublanes
        stats = jnp.concatenate([csum, csq, zeros], axis=0)   # (8, c)
        gstats = jnp.dot(stats, sel, preferred_element_type=jnp.float32)
        gsum, gsq = gstats[0:1], gstats[1:2]
    cnt = float(hw * cg)
    mean = gsum / cnt
    var = jnp.maximum(gsq / cnt - mean * mean, 0.0)      # biased variance
    inv = jax.lax.rsqrt(var + eps)
    scale = inv * gamma
    shift = beta - mean * scale
    return x * scale + shift


def gn_fused_kernel(x_ref, g_ref, b_ref, o_ref, *, num_groups, eps, relu):
    # Single-pass GroupNorm: stats + affine (+ ReLU), one batch slab per step.
    x = x_ref[0]                                         # (hw, c) f32
    cg = x.shape[1] // num_groups
    y = _gn_normalize(x, g_ref[...], b_ref[...], cg, eps)
    if relu:
        y = jnp.maximum(y, 0.0)
    o_ref[0] = y


def gn_fused_residual_kernel(x_ref, r_ref, g_ref, b_ref, o_ref, *,
                             num_groups, eps, relu):
    # Single-pass GroupNorm fused with residual add (+ ReLU).
    x = x_ref[0]
    cg = x.shape[1] // num_groups
    y = _gn_normalize(x, g_ref[...], b_ref[...], cg, eps) + r_ref[0]
    if relu:
        y = jnp.maximum(y, 0.0)
    o_ref[0] = y


def gn_stats_kernel(x_ref, sum_ref, sq_ref):
    # Fallback pass 1: per-channel sum / sum-of-squares over HW tiles.
    @pl.when(pl.program_id(1) == 0)
    def _():
        sum_ref[...] = jnp.zeros_like(sum_ref)
        sq_ref[...] = jnp.zeros_like(sq_ref)

    x = x_ref[0]                                         # (thw, C), f32
    sum_ref[0] += jnp.sum(x, axis=0, keepdims=True)
    sq_ref[0] += jnp.sum(x * x, axis=0, keepdims=True)


def gn_apply_kernel(x_ref, s_ref, t_ref, o_ref, *, relu):
    # Fallback pass 2: y = x * scale + shift.
    y = x_ref[0] * s_ref[0] + t_ref[0]
    if relu:
        y = jnp.maximum(y, 0.0)
    o_ref[0] = y


def gn_apply_residual_kernel(x_ref, r_ref, s_ref, t_ref, o_ref, *, relu):
    # Fallback pass 2 fused with residual add (+ ReLU).
    y = x_ref[0] * s_ref[0] + t_ref[0] + r_ref[0]
    if relu:
        y = jnp.maximum(y, 0.0)
    o_ref[0] = y


def maxpool_kernel(s_ref, o_ref):
    # s_ref: (9, tm, C) stacked window taps -> max over taps.
    o_ref[...] = jnp.max(s_ref[...], axis=0)


# ----------------------------------------------------------------------------
# Pallas wrappers
# ----------------------------------------------------------------------------
def standardize_weight(w2):
    """w2: (cout, K) f32 -> standardized (cout, K) f32."""
    cout, k = w2.shape
    tr = min(cout, 256)                                  # cout is a multiple of 32
    return pl.pallas_call(
        ws_kernel,
        out_shape=jax.ShapeDtypeStruct((cout, k), jnp.float32),
        grid=(pl.cdiv(cout, tr),),
        in_specs=[pl.BlockSpec((tr, k), lambda i: (i, 0))],
        out_specs=pl.BlockSpec((tr, k), lambda i: (i, 0)),
        compiler_params=pltpu.CompilerParams(
            dimension_semantics=("parallel",)),
    )(w2)


def pallas_matmul(a, b):
    """(M, K) @ (K, N) -> (M, N) f32. bf16 MXU operands, f32 accumulation,
    3-D tiling with M/N parallel (megacore) and K as the reduction axis."""
    m, k = a.shape
    _, n = b.shape
    # Round M up to a multiple of 8 (sublane) only when needed; tk/tn are
    # chosen as exact divisors so no garbage enters the K reduction.
    m_p = ((m + 7) // 8) * 8
    if m_p != m:
        a = jnp.pad(a, ((0, m_p - m), (0, 0)))
    tm = min(256, m_p)
    tn = _pick_tile(n, 512)
    tk = _pick_tile(k, 1536)
    a16 = a.astype(jnp.bfloat16)
    b16 = b.astype(jnp.bfloat16)
    out = pl.pallas_call(
        matmul_kernel,
        out_shape=jax.ShapeDtypeStruct((m_p, n), jnp.float32),
        grid=(pl.cdiv(m_p, tm), n // tn, k // tk),
        in_specs=[pl.BlockSpec((tm, tk), lambda i, j, kk: (i, kk)),
                  pl.BlockSpec((tk, tn), lambda i, j, kk: (kk, j))],
        out_specs=pl.BlockSpec((tm, tn), lambda i, j, kk: (i, j)),
        scratch_shapes=[pltpu.VMEM((tm, tn), jnp.float32)],
        compiler_params=pltpu.CompilerParams(
            dimension_semantics=("parallel", "parallel", "arbitrary"),
            vmem_limit_bytes=32 * 1024 * 1024),
    )(a16, b16)
    return out[:m] if m_p != m else out


def im2col(x, kh, kw, stride, pad):
    """x: NHWC bf16-castable. Returns (B*Ho*Wo, kh*kw*C) bf16 patches with
    tap-major / channel-minor K ordering (matching a (cout, kh, kw, cin)
    flattened weight), plus Ho, Wo."""
    # TODO(synk): avoid materializing the kh*kw-duplicated patch tensor in HBM
    # for 3x3 convs (fold the tap index into the K-tiled matmul index_map).
    x = x.astype(jnp.bfloat16)
    b, h, w, c = x.shape
    if pad > 0:
        x = jnp.pad(x, ((0, 0), (pad, pad), (pad, pad), (0, 0)))
    hp, wp = h + 2 * pad, w + 2 * pad
    ho = (hp - kh) // stride + 1
    wo = (wp - kw) // stride + 1
    slabs = []
    for i in range(kh):
        for j in range(kw):
            slabs.append(x[:, i:i + stride * (ho - 1) + 1:stride,
                           j:j + stride * (wo - 1) + 1:stride, :])
    patches = jnp.concatenate(slabs, axis=-1)            # (B, Ho, Wo, kh*kw*C)
    return patches.reshape(b * ho * wo, kh * kw * c), ho, wo


def std_conv2d(x, w, stride, pad):
    """StdConv2d (bias=False). x: NHWC, w: (cout, cin, kh, kw)."""
    cout, cin, kh, kw = w.shape
    b = x.shape[0]
    # Flatten the weight in (kh, kw, cin) order to match im2col's K ordering.
    w2 = jnp.transpose(w, (0, 2, 3, 1)).reshape(cout, kh * kw * cin)
    w2 = w2.astype(jnp.float32)
    w_std = standardize_weight(w2)                       # (cout, K) f32
    wmat = jnp.transpose(w_std)                          # (K, cout)

    if kh == 1 and kw == 1 and pad == 0:
        # 1x1 conv fast path: no im2col materialization, just a strided view.
        xs = x[:, ::stride, ::stride, :] if stride > 1 else x
        _, ho, wo, _ = xs.shape
        patches = xs.reshape(b * ho * wo, cin).astype(jnp.bfloat16)
    else:
        patches, ho, wo = im2col(x, kh, kw, stride, pad)

    out = pallas_matmul(patches, wmat)
    return out.reshape(b, ho, wo, cout)


def group_norm(x, gamma, beta, num_groups, eps, relu, residual=None):
    """GroupNorm over NHWC input (normalization per (batch, group)).
    Optionally fuses `relu(x_norm + residual)` into the same pass."""
    b, h, w, c = x.shape
    hw = h * w
    cg = c // num_groups
    x3 = x.reshape(b, hw, c)
    r3 = residual.reshape(b, hw, c) if residual is not None else None

    if hw * c <= _GN_FUSE_MAX_ELEMS:
        # Single fused pass: one HBM read of x, one write of y.
        g2 = gamma.reshape(1, c).astype(jnp.float32)
        b2 = beta.reshape(1, c).astype(jnp.float32)
        x_spec = pl.BlockSpec((1, hw, c), lambda i: (i, 0, 0))
        p_spec = pl.BlockSpec((1, c), lambda i: (0, 0))
        if residual is None:
            kern = functools.partial(gn_fused_kernel, num_groups=num_groups,
                                     eps=eps, relu=relu)
            args = (x3, g2, b2)
            in_specs = [x_spec, p_spec, p_spec]
        else:
            kern = functools.partial(gn_fused_residual_kernel,
                                     num_groups=num_groups, eps=eps, relu=relu)
            args = (x3, r3, g2, b2)
            in_specs = [x_spec,
                        pl.BlockSpec((1, hw, c), lambda i: (i, 0, 0)),
                        p_spec, p_spec]
        out = pl.pallas_call(
            kern,
            out_shape=jax.ShapeDtypeStruct((b, hw, c), jnp.float32),
            grid=(b,),
            in_specs=in_specs,
            out_specs=pl.BlockSpec((1, hw, c), lambda i: (i, 0, 0)),
            compiler_params=pltpu.CompilerParams(
                dimension_semantics=("parallel",),
                vmem_limit_bytes=64 * 1024 * 1024),
        )(*args)
        return out.reshape(b, h, w, c)

    # ---------------- fallback: two tiled passes (very large feature maps) ---
    thw = _pick_spatial_tile(hw)
    grid_bh = (b, hw // thw)

    csum, csq = pl.pallas_call(
        gn_stats_kernel,
        out_shape=(jax.ShapeDtypeStruct((b, 1, c), jnp.float32),
                   jax.ShapeDtypeStruct((b, 1, c), jnp.float32)),
        grid=grid_bh,
        in_specs=[pl.BlockSpec((1, thw, c), lambda i, j: (i, j, 0))],
        out_specs=(pl.BlockSpec((1, 1, c), lambda i, j: (i, 0, 0)),
                   pl.BlockSpec((1, 1, c), lambda i, j: (i, 0, 0))),
        compiler_params=pltpu.CompilerParams(
            dimension_semantics=("parallel", "arbitrary")),
    )(x3)

    cnt = float(hw * cg)
    gsum = csum.reshape(b, num_groups, cg).sum(axis=2)
    gsq = csq.reshape(b, num_groups, cg).sum(axis=2)
    gmean = gsum / cnt
    gvar = jnp.maximum(gsq / cnt - gmean * gmean, 0.0)   # biased variance
    inv = 1.0 / jnp.sqrt(gvar + eps)
    inv_c = jnp.repeat(inv, cg, axis=1)                  # (B, C)
    mean_c = jnp.repeat(gmean, cg, axis=1)               # (B, C)
    scale = (inv_c * gamma[None, :]).reshape(b, 1, c)
    shift = (beta[None, :] - mean_c * inv_c * gamma[None, :]).reshape(b, 1, c)

    if residual is None:
        kern = functools.partial(gn_apply_kernel, relu=relu)
        args = (x3, scale, shift)
        in_specs = [pl.BlockSpec((1, thw, c), lambda i, j: (i, j, 0)),
                    pl.BlockSpec((1, 1, c), lambda i, j: (i, 0, 0)),
                    pl.BlockSpec((1, 1, c), lambda i, j: (i, 0, 0))]
    else:
        kern = functools.partial(gn_apply_residual_kernel, relu=relu)
        args = (x3, r3, scale, shift)
        in_specs = [pl.BlockSpec((1, thw, c), lambda i, j: (i, j, 0)),
                    pl.BlockSpec((1, thw, c), lambda i, j: (i, j, 0)),
                    pl.BlockSpec((1, 1, c), lambda i, j: (i, 0, 0)),
                    pl.BlockSpec((1, 1, c), lambda i, j: (i, 0, 0))]

    out = pl.pallas_call(
        kern,
        out_shape=jax.ShapeDtypeStruct((b, hw, c), jnp.float32),
        grid=grid_bh,
        in_specs=in_specs,
        out_specs=pl.BlockSpec((1, thw, c), lambda i, j: (i, j, 0)),
        compiler_params=pltpu.CompilerParams(
            dimension_semantics=("parallel", "parallel")),
    )(*args)
    return out.reshape(b, h, w, c)


def max_pool_3x3_s2(x):
    """MaxPool2d(kernel=3, stride=2, padding=0) on NHWC, row-tiled."""
    # TODO(synk): read taps in-kernel (strided ref slices) instead of stacking
    # 9 shifted copies in HBM (only runs once, on the small root feature).
    b, h, w, c = x.shape
    ho = (h - 3) // 2 + 1
    wo = (w - 3) // 2 + 1
    slabs = []
    for i in range(3):
        for j in range(3):
            slabs.append(x[:, i:i + 2 * (ho - 1) + 1:2,
                           j:j + 2 * (wo - 1) + 1:2, :])
    m = b * ho * wo
    stacked = jnp.stack(slabs, axis=0).reshape(9, m, c)
    tmr = m if m <= 1024 else 512
    out = pl.pallas_call(
        maxpool_kernel,
        out_shape=jax.ShapeDtypeStruct((m, c), jnp.float32),
        grid=(pl.cdiv(m, tmr),),
        in_specs=[pl.BlockSpec((9, tmr, c), lambda i: (0, i, 0))],
        out_specs=pl.BlockSpec((tmr, c), lambda i: (i, 0)),
        compiler_params=pltpu.CompilerParams(
            dimension_semantics=("parallel",)),
    )(stacked)
    return out.reshape(b, ho, wo, c)


# ----------------------------------------------------------------------------
# Model: parameters + forward
# ----------------------------------------------------------------------------
def _conv_init(key, cout, cin, kh, kw):
    return 0.1 * jax.random.normal(key, (cout, cin, kh, kw), jnp.float32)


def init_bottleneck(key, cin, cout, cmid, stride):
    ks = jax.random.split(key, 4)
    p = {
        "stride": stride,
        "conv1_w": _conv_init(ks[0], cmid, cin, 1, 1),
        "gn1_w": jnp.ones((cmid,), jnp.float32),
        "gn1_b": jnp.zeros((cmid,), jnp.float32),
        "conv2_w": _conv_init(ks[1], cmid, cmid, 3, 3),
        "gn2_w": jnp.ones((cmid,), jnp.float32),
        "gn2_b": jnp.zeros((cmid,), jnp.float32),
        "conv3_w": _conv_init(ks[2], cout, cmid, 1, 1),
        "gn3_w": jnp.ones((cout,), jnp.float32),
        "gn3_b": jnp.zeros((cout,), jnp.float32),
    }
    if stride != 1 or cin != cout:
        p["down_w"] = _conv_init(ks[3], cout, cin, 1, 1)
        p["gnp_w"] = jnp.ones((cout,), jnp.float32)
        p["gnp_b"] = jnp.zeros((cout,), jnp.float32)
    return p


def init_resnetv2(key, block_units, width_factor):
    width = int(64 * width_factor)
    kroot, kb = jax.random.split(key)
    params = {
        "width": width,
        "root_conv": _conv_init(kroot, width, 3, 7, 7),
        "root_gn_w": jnp.ones((width,), jnp.float32),
        "root_gn_b": jnp.zeros((width,), jnp.float32),
    }
    blocks = []
    configs = [
        [(width, width * 4, width, 1)] +
        [(width * 4, width * 4, width, 1) for _ in range(block_units[0] - 1)],
        [(width * 4, width * 8, width * 2, 2)] +
        [(width * 8, width * 8, width * 2, 1) for _ in range(block_units[1] - 1)],
        [(width * 8, width * 16, width * 4, 2)] +
        [(width * 16, width * 16, width * 4, 1) for _ in range(block_units[2] - 1)],
    ]
    for block_cfg in configs:
        units = []
        for (cin, cout, cmid, stride) in block_cfg:
            kb, ku = jax.random.split(kb)
            units.append(init_bottleneck(ku, cin, cout, cmid, stride))
        blocks.append(units)
    params["blocks"] = blocks
    return params


def bottleneck_forward(x, p):
    if "down_w" in p:
        residual = std_conv2d(x, p["down_w"], stride=p["stride"], pad=0)
        cout = residual.shape[-1]
        # gn_proj = nn.GroupNorm(cout, cout) -> per-channel, default eps=1e-5
        residual = group_norm(residual, p["gnp_w"], p["gnp_b"],
                              num_groups=cout, eps=1e-5, relu=False)
    else:
        residual = x
    y = std_conv2d(x, p["conv1_w"], stride=1, pad=0)
    y = group_norm(y, p["gn1_w"], p["gn1_b"], 32, 1e-6, relu=True)
    y = std_conv2d(y, p["conv2_w"], stride=p["stride"], pad=1)
    y = group_norm(y, p["gn2_w"], p["gn2_b"], 32, 1e-6, relu=True)
    y = std_conv2d(y, p["conv3_w"], stride=1, pad=0)
    # gn3 + residual add + ReLU fused into a single tiled pass.
    y = group_norm(y, p["gn3_w"], p["gn3_b"], 32, 1e-6, relu=True,
                   residual=residual)
    return y


def resnetv2_forward(x_nchw, params):
    """Input x: NCHW (like PyTorch). Returns (x, features[::-1]) in NCHW."""
    b = x_nchw.shape[0]
    in_size = x_nchw.shape[2]
    x = jnp.transpose(x_nchw, (0, 2, 3, 1)).astype(jnp.float32)  # -> NHWC

    # root: StdConv2d(3, width, 7, stride=2, pad=3) + GN(32) + ReLU
    x = std_conv2d(x, params["root_conv"], stride=2, pad=3)
    x = group_norm(x, params["root_gn_w"], params["root_gn_b"],
                   32, 1e-6, relu=True)
    features = [x]

    # MaxPool2d(kernel=3, stride=2, padding=0)
    x = max_pool_3x3_s2(x)

    blocks = params["blocks"]
    for i in range(len(blocks) - 1):
        for unit in blocks[i]:
            x = bottleneck_forward(x, unit)
        right_size = int(in_size / 4 / (i + 1))
        if x.shape[1] != right_size:
            pad = right_size - x.shape[1]
            assert 3 > pad > 0, "x {} should {}".format(x.shape, right_size)
            feat = jnp.zeros((b, right_size, right_size, x.shape[3]),
                             dtype=x.dtype)
            feat = feat.at[:, :x.shape[1], :x.shape[2], :].set(x)
        else:
            feat = x
        features.append(feat)

    for unit in blocks[-1]:
        x = bottleneck_forward(x, unit)

    to_nchw = lambda t: jnp.transpose(t, (0, 3, 1, 2))
    return to_nchw(x), [to_nchw(f) for f in features[::-1]]


# ----------------------------------------------------------------------------
if __name__ == "__main__":
    key = jax.random.PRNGKey(0)
    kx, kp = jax.random.split(key)

    # Small config: ResNetV2(block_units=(1, 1, 1), width_factor=0.5) -> width=32
    block_units = (1, 1, 1)
    width_factor = 0.5
    params = init_resnetv2(kp, block_units, width_factor)

    # Input: NCHW, batch=2, 3 channels, 32x32 spatial.
    x = jax.random.normal(kx, (2, 3, 32, 32), jnp.float32)

    out, feats = resnetv2_forward(x, params)
    jax.block_until_ready(out)
    for f in feats:
        jax.block_until_ready(f)

    # Expected shapes (NCHW): out (2,512,2,2);
    # features[::-1] = [(2,256,4,4), (2,128,8,8), (2,32,16,16)]
    assert out.shape == (2, 512, 2, 2)
    assert feats[0].shape == (2, 256, 4, 4)
    assert feats[1].shape == (2, 128, 8, 8)
    assert feats[2].shape == (2, 32, 16, 16)

    print("KERNEL_OK")
</pallas_src>

<mosaic_0001>
module attributes {stable_mosaic.version = 11 : i64} {
  func.func @ws_kernel(%arg0: i32, %arg1: memref<32x147xf32, #tpu.memory_space<vmem>>, %arg2: memref<32x147xf32, #tpu.memory_space<vmem>>) attributes {dimension_semantics = [#tpu.dimension_semantics<parallel>], iteration_bounds = array<i64: 1>, scalar_prefetch = 0 : i64, scratch_operands = 0 : i64, tpu.core_type = #tpu.core_type<tc>, window_params = [{transform_indices = @transform_0, window_bounds = array<i64: 32, 147>}, {transform_indices = @transform_1, window_bounds = array<i64: 32, 147>}]} {
    %c0 = arith.constant 0 : index
    %c0_0 = arith.constant 0 : index
    %0 = vector.load %arg1[%c0, %c0_0] : memref<32x147xf32, #tpu.memory_space<vmem>>, vector<32x147xf32>
    %cst = arith.constant dense<0.000000e+00> : vector<32xf32>
    %1 = vector.multi_reduction <add>, %0, %cst [1] : vector<32x147xf32> to vector<32xf32>
    %2 = vector.shape_cast %1 : vector<32xf32> to vector<32x1xf32>
    %cst_1 = arith.constant 1.470000e+02 : f32
    %3 = vector.broadcast %cst_1 : f32 to vector<32x1xf32>
    %4 = arith.divf %2, %3 : vector<32x1xf32>
    %5 = arith.mulf %0, %0 : vector<32x147xf32>
    %cst_2 = arith.constant dense<0.000000e+00> : vector<32xf32>
    %6 = vector.multi_reduction <add>, %5, %cst_2 [1] : vector<32x147xf32> to vector<32xf32>
    %7 = vector.shape_cast %6 : vector<32xf32> to vector<32x1xf32>
    %cst_3 = arith.constant 1.470000e+02 : f32
    %8 = vector.broadcast %cst_3 : f32 to vector<32x1xf32>
    %9 = arith.divf %7, %8 : vector<32x1xf32>
    %10 = arith.mulf %4, %4 : vector<32x1xf32>
    %11 = arith.subf %9, %10 : vector<32x1xf32>
    %cst_4 = arith.constant 0.000000e+00 : f32
    %12 = vector.broadcast %cst_4 : f32 to vector<32x1xf32>
    %13 = arith.maximumf %11, %12 : vector<32x1xf32>
    %14 = vector.broadcast %4 : vector<32x1xf32> to vector<32x147xf32>
    %15 = arith.subf %0, %14 : vector<32x147xf32>
    %cst_5 = arith.constant 9.99999974E-6 : f32
    %16 = vector.broadcast %cst_5 : f32 to vector<32x1xf32>
    %17 = arith.addf %13, %16 : vector<32x1xf32>
    %18 = math.sqrt %17 : vector<32x1xf32>
    %19 = vector.broadcast %18 : vector<32x1xf32> to vector<32x147xf32>
    %20 = arith.divf %15, %19 : vector<32x147xf32>
    %c0_6 = arith.constant 0 : index
    %c0_7 = arith.constant 0 : index
    %21 = vector.load %arg2[%c0_6, %c0_7] : memref<32x147xf32, #tpu.memory_space<vmem>>, vector<32x147xf32>
    tpu.vector_store %arg2[%c0_6, %c0_7], %20 {strides = array<i32>} : memref<32x147xf32, #tpu.memory_space<vmem>>, vector<32x147xf32>,
    return
  }
  func.func @transform_0(%arg0: i32) -> (i32, i32) {
    %c0_i32 = arith.constant 0 : i32
    %c0_i32_0 = arith.constant 0 : i32
    return %arg0, %c0_i32 : i32, i32
  }
  func.func @transform_1(%arg0: i32) -> (i32, i32) {
    %c0_i32 = arith.constant 0 : i32
    %c0_i32_0 = arith.constant 0 : i32
    return %arg0, %c0_i32 : i32, i32
  }
}

</mosaic_0001>

<bundles_post_ra>
// kernel: tpu_custom_call.1
= control target key start
LH: loop header
LB: loop body
LE: loop exit
PB: predicated region body
PF: predicated region fallthrough
CT: control target
= control target key end

     0   :  { %6 = vsyncpa [#allocation3], 0  ;;  %s344_s0 = inlined_call_operand.hbm [shape: f32[32,147], index: 0, kind: input, shape index: {}]   ;;  %s345_s1 = inlined_call_operand.hbm [shape: f32[32,147], index: 1, kind: output, shape index: {}]  }
   0x1   :  { %7 = vsyncpa [#allocation4], 0  ;;  %s234_s6 = smov [#allocation2]  }
   0x2   :  { %s13_s7 = sshll.u32 %s234_s6, 4  ;;  %s14_s7 = int_to_ptr.vmem [resolvable:$true] %s13_s7 }
   0x3   :  { %s198_s8 = scalar_lea.vmem %s14_s7, 1024  ;;  %p203_p1 = scmp.lt.s32.totalorder %s14_s7, %s14_s7 }
   0x4   :  { %p199_p0 = scmp.ne.s32.totalorder %s14_s7, %s198_s8  ;;  %p204_p2 = scmp.lt.s32.totalorder %s198_s8, %s198_s8 }
   0x6   :  { %p205_p3 = por %p204_p2, %p203_p1 }
   0x8   :  { %p206_p4 = pnand %p205_p3, %p199_p0 }
   0xa   :  { %209 = shalt.err (!%p206_p4)
}
   0xb   :  { %s235_s9 = smov 256   ;;  %s236_s10 = smov 16  }
   0xc   :  { %19 = dma.hbm_to_vmem [thread:$0]  %s344_s0, 1024, %s14_s7, [#allocation3], %s235_s9, %s235_s9, %s236_s10  }
   0xd   :  { %230 = dma.done.wait [#allocation3], 1024  }
   0xe   :  { %231 = vsyncadd [#allocation3], 4294966272  ;;  %vm31_vm0 = vcmask 154624   ;;  %v254_v0 = vld [vmem:[#allocation2 + $0x20] sm:$0xff]  ;;  %v256_v1 = vld [vmem:[#allocation2 + $0x28] sm:$0xff]  ;;  %s237_s0 = smov [#allocation5]  }
   0xf   :  { %v258_v2 = vld [vmem:[#allocation2] sm:$0xff]  ;;  %v40_v3 = vsel %vm31_vm0, %v256_v1, 0.0  ;;  %v262_v4 = vld [vmem:[#allocation2 + $0x8] sm:$0xff]  ;;  %v264_v5 = vld [vmem:[#allocation2 + $0x30] sm:$0xff]  ;;  %v58_v23 = vmul.f32 %v256_v1, %v256_v1  ;;  %v57_v28 = vmul.f32 %v254_v0, %v254_v0  ;;  %s158_s13 = sshll.u32 %s237_s0, 4  ;;  %s159_s13 = int_to_ptr.vmem [resolvable:$true] %s158_s13 }
  0x10   :  { %v266_v6 = vld [vmem:[#allocation2 + $0x38] sm:$0xff]  ;;  %v41_v7 = vadd.f32 %v40_v3, %v254_v0  ;;  %v32_v8 = vsel %vm31_vm0, %v262_v4, 0.0  ;;  %v273_v10 = vld [vmem:[#allocation2 + $0x10] sm:$0xff]  ;;  %v54_v12 = vmul.f32 %v262_v4, %v262_v4  ;;  %v53_v19 = vmul.f32 %v258_v2, %v258_v2  ;;  %s210_s14 = scalar_lea.vmem %s159_s13, 1024  ;;  %p215_p6 = scmp.lt.s32.totalorder %s159_s13, %s159_s13 }
  0x11   :  { %v44_v9 = vsel %vm31_vm0, %v266_v6, 0.0  ;;  %v275_v11 = vld [vmem:[#allocation2 + $0x18] sm:$0xff]  ;;  %v33_v13 = vadd.f32 %v32_v8, %v258_v2  ;;  %v55_v16 = vmul.f32 %v273_v10, %v273_v10  ;;  %v60_v20 = vmul.f32 %v266_v6, %v266_v6  ;;  %p211_p5 = scmp.ne.s32.totalorder %s159_s13, %s210_s14  ;;  %p216_p7 = scmp.lt.s32.totalorder %s210_s14, %s210_s14 }
  0x12   :  { %v36_v14 = vsel %vm31_vm0, %v275_v11, 0.0  ;;  %42 = vadd.xlane.f32.xlu1 %v41_v7  ;;  %v45_v15 = vadd.f32 %v44_v9, %v264_v5  ;;  %v56_v17 = vmul.f32 %v275_v11, %v275_v11  ;;  %v61_v22 = vsel %vm31_vm0, %v54_v12, 0.0 }
  0x13   :  { %34 = vadd.xlane.f32.xlu0 %v33_v13  ;;  %v37_v18 = vadd.f32 %v36_v14, %v273_v10  ;;  %v59_v25 = vmul.f32 %v264_v5, %v264_v5  ;;  %v62_v26 = vadd.f32 %v61_v22, %v53_v19  ;;  %v73_v27 = vsel %vm31_vm0, %v60_v20, 0.0  ;;  %p217_p8 = por %p216_p7, %p215_p6 }
  0x14   :  { %v65_v21 = vsel %vm31_vm0, %v56_v17, 0.0  ;;  %v69_v29 = vsel %vm31_vm0, %v58_v23, 0.0 }
  0x15   :  { %v66_v24 = vadd.f32 %v65_v21, %v55_v16  ;;  %v74_v30 = vadd.f32 %v73_v27, %v59_v25  ;;  %v70_v31 = vadd.f32 %v69_v29, %v57_v28  ;;  %p218_p9 = pnand %p217_p8, %p211_p5 }
  0x16   :  { %46 = vadd.xlane.f32.xlu1 %v45_v15 }
  0x17   :  { %38 = vadd.xlane.f32.xlu0 %v37_v18 }
  0x1a   :  { %67 = vadd.xlane.f32.xlu1 %v66_v24 }
  0x1b   :  { %63 = vadd.xlane.f32.xlu0 %v62_v26 }
  0x1e   :  { %75 = vadd.xlane.f32.xlu1 %v74_v30 }
  0x1f   :  { %71 = vadd.xlane.f32.xlu0 %v70_v31 }
  0x9b   :  { %v43_v32 = vpop.xlane.xlu1 %42 }
  0x9c   :  { %v35_v33 = vpop.xlane.xlu0 %34  ;;  %v310_v43 = vmul.f32 0.006802721, %v43_v32 }
  0x9d   :  { %v302_v36 = vmul.f32 0.006802721, %v35_v33 }
  0x9e   :  { %v83_v54 = vmul.f32 %v310_v43, %v310_v43 }
  0x9f   :  { %v47_v34 = vpop.xlane.xlu1 %46  ;;  %v81_v44 = vmul.f32 %v302_v36, %v302_v36  ;;  %v93_v31 = vsub.f32 %v258_v2, %v302_v36  ;;  %v94_v32 = vsub.f32 %v262_v4, %v302_v36  ;;  %v98_v36 = vsub.f32 %v256_v1, %v310_v43 }
  0xa0   :  { %v39_v35 = vpop.xlane.xlu0 %38  ;;  %v306_v39 = vmul.f32 0.006802721, %v47_v34 }
  0xa1   :  { %v304_v37 = vmul.f32 0.006802721, %v39_v35 }
  0xa2   :  { %v84_v50 = vmul.f32 %v306_v39, %v306_v39  ;;  %v100_v2 = vsub.f32 %v266_v6, %v306_v39 }
  0xa3   :  { %v68_v38 = vpop.xlane.xlu1 %67  ;;  %v82_v41 = vmul.f32 %v304_v37, %v304_v37  ;;  %v95_v28 = vsub.f32 %v273_v10, %v304_v37  ;;  %v96_v29 = vsub.f32 %v275_v11, %v304_v37  ;;  %v99_v10 = vsub.f32 %v264_v5, %v306_v39 }
  0xa4   :  { %v78_v40 = vmul.f32 0.006802721, %v68_v38  ;;  %v64_v42 = vpop.xlane.xlu0 %63  ;;  %v97_v11 = vsub.f32 %v254_v0, %v310_v43 }
  0xa5   :  { %v77_v45 = vmul.f32 0.006802721, %v64_v42 }
  0xa6   :  { %v86_v46 = vsub.f32 %v78_v40, %v82_v41 }
  0xa7   :  { %v85_v47 = vsub.f32 %v77_v45, %v81_v44  ;;  %v76_v48 = vpop.xlane.xlu1 %75 }
  0xa8   :  { %v90_v49 = vmax.f32 %v86_v46, 0.0  ;;  %v80_v51 = vmul.f32 0.006802721, %v76_v48  ;;  %v72_v52 = vpop.xlane.xlu0 %71 }
  0xa9   :  { %v89_v53 = vmax.f32 %v85_v47, 0.0  ;;  %v79_v55 = vmul.f32 0.006802721, %v72_v52 }
  0xaa   :  { %v102_v56 = vadd.f32 1e-05, %v90_v49  ;;  %v88_v57 = vsub.f32 %v80_v51, %v84_v50 }
  0xab   :  { %v101_v58 = vadd.f32 1e-05, %v89_v53  ;;  %v87_v59 = vsub.f32 %v79_v55, %v83_v54 }
  0xac   :  { %174 = vrsqrt.f32 %v102_v56  ;;  %v92_v60 = vmax.f32 %v88_v57, 0.0  ;;  %vm114_vm1 = vcmp.eq.f32.partialorder %v102_v56, inf  ;;  %v117_v9 = vand.u32 2147483648, %v102_v56 }
  0xad   :  { %176 = vrsqrt.f32 %v101_v58  ;;  %v91_v61 = vmax.f32 %v87_v59, 0.0  ;;  %vm116_vm2 = vcmp.eq.f32.partialorder %v102_v56, 0.0  ;;  %vm107_vm3 = vcmp.eq.f32.partialorder %v101_v58, inf }
  0xae   :  { %v104_v62 = vadd.f32 1e-05, %v92_v60  ;;  %v110_v14 = vand.u32 2147483648, %v101_v58  ;;  %vm109_vm4 = vcmp.eq.f32.partialorder %v101_v58, 0.0 }
  0xaf   :  { %v103_v63 = vadd.f32 1e-05, %v91_v61 }
  0xb0   :  { %178 = vrsqrt.f32 %v104_v62  ;;  %vm128_vm5 = vcmp.eq.f32.partialorder %v104_v62, inf  ;;  %v131_v21 = vand.u32 2147483648, %v104_v62  ;;  %vm130_vm6 = vcmp.eq.f32.partialorder %v104_v62, 0.0 }
  0xb1   :  { %180 = vrsqrt.f32 %v103_v63  ;;  %vm121_vm7 = vcmp.eq.f32.partialorder %v103_v63, inf  ;;  %v124_v24 = vand.u32 2147483648, %v103_v63  ;;  %vm123_vm8 = vcmp.eq.f32.partialorder %v103_v63, 0.0 }
  0xb9   :  { %v175_v3 = vpop.eup %174 }
  0xba   :  { %v177_v7 = vpop.eup %176  ;;  %v113_v8 = vmul.f32 %v175_v3, %v102_v56 }
  0xbb   :  { %v106_v12 = vmul.f32 %v177_v7, %v101_v58 }
  0xbc   :  { %v115_v13 = vsel %vm114_vm1, %v102_v56, %v113_v8 }
  0xbd   :  { %v118_v15 = vsel %vm116_vm2, %v117_v9, %v115_v13  ;;  %v108_v16 = vsel %vm107_vm3, %v101_v58, %v106_v12  ;;  %v179_v18 = vpop.eup %178 }
  0xbe   :  { %182 = vrcp.f32 %v118_v15  ;;  %v111_v17 = vsel %vm109_vm4, %v110_v14, %v108_v16  ;;  %v181_v19 = vpop.eup %180  ;;  %v127_v20 = vmul.f32 %v179_v18, %v104_v62 }
  0xbf   :  { %184 = vrcp.f32 %v111_v17  ;;  %v120_v22 = vmul.f32 %v181_v19, %v103_v63 }
  0xc0   :  { %v129_v23 = vsel %vm128_vm5, %v104_v62, %v127_v20 }
  0xc1   :  { %v132_v25 = vsel %vm130_vm6, %v131_v21, %v129_v23  ;;  %v122_v26 = vsel %vm121_vm7, %v103_v63, %v120_v22 }
  0xc2   :  { %186 = vrcp.f32 %v132_v25  ;;  %v125_v27 = vsel %vm123_vm8, %v124_v24, %v122_v26 }
  0xc3   :  { %188 = vrcp.f32 %v125_v27 }
  0xcb   :  { %v183_v30 = vpop.eup %182 }
  0xcc   :  { %v185_v33 = vpop.eup %184  ;;  %v137_v34 = vmul.f32 %v183_v30, %v95_v28  ;;  %v138_v35 = vmul.f32 %v183_v30, %v96_v29 }
  0xcd   :  { %v134_v38 = vmul.f32 %v185_v33, %v93_v31  ;;  %v135_v40 = vmul.f32 %v185_v33, %v94_v32 }
  0xce   :  { %147 = vst [vmem:[#allocation5 + $0x10] sm:$0xff] %v137_v34  ;;  %148 = vst.msk [vmem:[#allocation5 + $0x18] sm:$0xff] %vm31_vm0, %v138_v35 }
  0xcf   :  { %145 = vst [vmem:[#allocation5] sm:$0xff] %v134_v38  ;;  %146 = vst.msk [vmem:[#allocation5 + $0x8] sm:$0xff] %vm31_vm0, %v135_v40  ;;  %v187_v4 = vpop.eup %186 }
  0xd0   :  { %v189_v37 = vpop.eup %188  ;;  %v143_v41 = vmul.f32 %v187_v4, %v99_v10  ;;  %v144_v42 = vmul.f32 %v187_v4, %v100_v2 }
  0xd1   :  { %v140_v44 = vmul.f32 %v189_v37, %v97_v11  ;;  %v141_v45 = vmul.f32 %v189_v37, %v98_v36 }
  0xd2   :  { %151 = vst [vmem:[#allocation5 + $0x30] sm:$0xff] %v143_v41  ;;  %152 = vst.msk [vmem:[#allocation5 + $0x38] sm:$0xff] %vm31_vm0, %v144_v42 }
  0xd3   :  { %149 = vst [vmem:[#allocation5 + $0x20] sm:$0xff] %v140_v44  ;;  %150 = vst.msk [vmem:[#allocation5 + $0x28] sm:$0xff] %vm31_vm0, %v141_v45 }
  0xd4   :  { %221 = shalt.err (!%p218_p9)
}
  0xd5   :  { %164 = dma.vmem_to_hbm [thread:$0]  %s159_s13, 1024, %s345_s1, [#allocation4], %s235_s9, %s235_s9, %s236_s10  }
  0xd6   :  { %232 = dma.done.wait [#allocation4], 1024  }
  0xd7   :  { %233 = vsyncadd [#allocation4], 4294966272 }
  0xd8   :  { %168 = vsyncpa [#allocation3], 1 }
  0xd9   :  { %169 = vsyncpa [#allocation4], 1 }

</bundles_post_ra>
